<compile_context>
chip_gen: v5e
topology: v5e:2x2
jax: 0.10.0
libtpu: 0.0.40
codegen_flags: <defaults>
</compile_context>

<pallas_src>
import jax
import jax.numpy as jnp
from jax import lax
from jax.experimental import pallas as pl
from jax.experimental.pallas import tpu as pltpu


TILE_B = 16384  # batch rows per grid step (multiple of 128)


def _sigmoid(h):
    # Exact sigmoid: exp on the EUP slot + exact f32 divide (hidden under DMA).
    return 1.0 / (1.0 + jnp.exp(-h))


def _mlp_kernel(x_ref, w1_ref, b1_ref, w2_ref, b2_ref, w3_ref, b3_ref, y_ref):
    x = x_ref[...]                                                       # (T, 8)
    # Layer 1: contract x's feature (minor) axis against w1's fan-in axis on-chip
    # -> (6, T), i.e. features on sublanes, batch on lanes (lane-dense from here on).
    h1 = lax.dot_general(w1_ref[...], x,
                         dimension_numbers=(((1,), (1,)), ((), ())),
                         preferred_element_type=jnp.float32)             # (6, T)
    a1 = _sigmoid(h1 + b1_ref[...])                                      # (6, T)
    a2 = _sigmoid(jnp.dot(w2_ref[...], a1,
                          preferred_element_type=jnp.float32)
                  + b2_ref[...])                                         # (4, T)
    y_ref[...] = _sigmoid(jnp.dot(w3_ref[...], a2,
                                  preferred_element_type=jnp.float32)
                          + b3_ref[...])                                 # (1, T)


def _round_up(n, m):
    return ((n + m - 1) // m) * m


def init_params(key):
    # W stored as (out, in) (torch layout), bias as (out, 1) so it lane-broadcasts
    # over the batch axis. Torch-default uniform(-1/sqrt(fan_in), 1/sqrt(fan_in)).
    def linear(k, fan_in, fan_out):
        kw, kb = jax.random.split(k)
        bound = 1.0 / jnp.sqrt(float(fan_in))
        w = jax.random.uniform(kw, (fan_out, fan_in), jnp.float32, -bound, bound)
        b = jax.random.uniform(kb, (fan_out, 1), jnp.float32, -bound, bound)
        return w, b

    k1, k2, k3 = jax.random.split(key, 3)
    w1, b1 = linear(k1, 8, 6)
    w2, b2 = linear(k2, 6, 4)
    w3, b3 = linear(k3, 4, 1)
    return (w1, b1, w2, b2, w3, b3)


@jax.jit
def wide_and_deep(x, params):
    w1, b1, w2, b2, w3, b3 = params
    B, F = x.shape

    # x stays in its natural (B, F) layout (single contiguous HBM DMA per tile).
    # Only batches smaller than one 128-lane tile get padded (cost is negligible);
    # larger batches use Pallas' ragged trailing block instead of a full-array pad.
    if B < 128:
        x_in = jnp.pad(x, ((0, 128 - B), (0, 0)))
        b_in = 128
    else:
        x_in = x
        b_in = B

    # Tile: large enough to amortize per-step pipeline overhead, capped so the grid
    # keeps >=2 steps when possible (v7x megacore), and always a multiple of 128.
    # (For b_in >= 128 this is always <= b_in, so only the trailing block is partial.)
    tile_b = min(TILE_B, _round_up(pl.cdiv(b_in, 2), 128))
    grid = (pl.cdiv(b_in, tile_b),)

    const = lambda i: (0, 0)  # weights/biases stay resident in VMEM across steps
    y_t = pl.pallas_call(
        _mlp_kernel,
        out_shape=jax.ShapeDtypeStruct((1, b_in), jnp.float32),
        grid=grid,
        in_specs=[
            pl.BlockSpec((tile_b, F), lambda i: (i, 0)),   # natural-layout x tile
            pl.BlockSpec(w1.shape, const),
            pl.BlockSpec(b1.shape, const),
            pl.BlockSpec(w2.shape, const),
            pl.BlockSpec(b2.shape, const),
            pl.BlockSpec(w3.shape, const),
            pl.BlockSpec(b3.shape, const),
        ],
        out_specs=pl.BlockSpec((1, tile_b), lambda i: (0, i)),  # lane-dense output
        compiler_params=pltpu.CompilerParams(
            dimension_semantics=("parallel",),
            vmem_limit_bytes=32 * 1024 * 1024,
        ),
        cost_estimate=pl.CostEstimate(
            flops=152 * b_in,             # 2*(8*6 + 6*4 + 4*1) per row
            transcendentals=11 * b_in,    # 6 + 4 + 1 exps per row
            bytes_accessed=36 * b_in,     # 32 B read + 4 B written per row
        ),
    )(x_in, w1, b1, w2, b2, w3, b3)

    # (1, B) and (B, 1) are bit-identical row-major; this slice+reshape moves only
    # 4*B bytes (negligible vs. the kernel's 36 B/row).
    return y_t[0, :B].reshape(B, 1)


def reference(x, params):
    # Pure-JAX reference at highest matmul precision (true f32 semantics).
    w1, b1, w2, b2, w3, b3 = params
    hp = lax.Precision.HIGHEST
    a1 = jax.nn.sigmoid(jnp.dot(x, w1.T, precision=hp) + b1.T)
    a2 = jax.nn.sigmoid(jnp.dot(a1, w2.T, precision=hp) + b2.T)
    return jax.nn.sigmoid(jnp.dot(a2, w3.T, precision=hp) + b3.T)


if __name__ == "__main__":
    key = jax.random.PRNGKey(0)
    kx, kp = jax.random.split(key)
    B = 8
    x = jax.random.normal(kx, (B, 8), dtype=jnp.float32)
    params = init_params(kp)

    y = wide_and_deep(x, params)
    jax.block_until_ready(y)

    y_ref = reference(x, params)
    assert y.shape == (B, 1), y.shape
    # Sigmoid is now exact; remaining tolerance budget only covers possible MXU
    # multi-pass f32 matmul vs. XLA reference precision differences (<~1e-3).
    assert jnp.allclose(y, y_ref, atol=2e-3, rtol=2e-3), "mismatch vs reference"

    print("KERNEL_OK")
</pallas_src>

<mosaic_0001>
module attributes {stable_mosaic.version = 11 : i64} {
  func.func @_mlp_kernel(%arg0: i32, %arg1: memref<128x8xf32, #tpu.memory_space<vmem>>, %arg2: memref<6x8xf32, #tpu.memory_space<vmem>>, %arg3: memref<6x1xf32, #tpu.memory_space<vmem>>, %arg4: memref<4x6xf32, #tpu.memory_space<vmem>>, %arg5: memref<4x1xf32, #tpu.memory_space<vmem>>, %arg6: memref<1x4xf32, #tpu.memory_space<vmem>>, %arg7: memref<1x1xf32, #tpu.memory_space<vmem>>, %arg8: memref<1x128xf32, #tpu.memory_space<vmem>>) attributes {dimension_semantics = [#tpu.dimension_semantics<parallel>], iteration_bounds = array<i64: 1>, scalar_prefetch = 0 : i64, scratch_operands = 0 : i64, tpu.core_type = #tpu.core_type<tc>, window_params = [{transform_indices = @transform_0, window_bounds = array<i64: 128, 8>}, {pipeline_mode = #tpu.pipeline_mode<synchronous>, transform_indices = @transform_1, window_bounds = array<i64: 6, 8>}, {pipeline_mode = #tpu.pipeline_mode<synchronous>, transform_indices = @transform_2, window_bounds = array<i64: 6, 1>}, {pipeline_mode = #tpu.pipeline_mode<synchronous>, transform_indices = @transform_3, window_bounds = array<i64: 4, 6>}, {pipeline_mode = #tpu.pipeline_mode<synchronous>, transform_indices = @transform_4, window_bounds = array<i64: 4, 1>}, {pipeline_mode = #tpu.pipeline_mode<synchronous>, transform_indices = @transform_5, window_bounds = array<i64: 1, 4>}, {pipeline_mode = #tpu.pipeline_mode<synchronous>, transform_indices = @transform_6, window_bounds = array<i64: 1, 1>}, {transform_indices = @transform_7, window_bounds = array<i64: 1, 128>}]} {
    %c0 = arith.constant 0 : index
    %c0_0 = arith.constant 0 : index
    %0 = vector.load %arg1[%c0, %c0_0] : memref<128x8xf32, #tpu.memory_space<vmem>>, vector<128x8xf32>
    %c0_1 = arith.constant 0 : index
    %c0_2 = arith.constant 0 : index
    %1 = vector.load %arg2[%c0_1, %c0_2] : memref<6x8xf32, #tpu.memory_space<vmem>>, vector<6x8xf32>
    %cst = arith.constant dense<0.000000e+00> : vector<6x128xf32>
    %2 = tpu.matmul %1, %0, %cst {dimension_numbers = #tpu.dot_dimension_numbers<[1], [1], [0], [0], [0, 0, 1, 0], [], []>} : vector<6x8xf32>, vector<128x8xf32>, vector<6x128xf32> -> vector<6x128xf32>
    %c0_3 = arith.constant 0 : index
    %c0_4 = arith.constant 0 : index
    %3 = vector.load %arg3[%c0_3, %c0_4] : memref<6x1xf32, #tpu.memory_space<vmem>>, vector<6x1xf32>
    %4 = vector.broadcast %3 : vector<6x1xf32> to vector<6x128xf32>
    %5 = arith.addf %2, %4 : vector<6x128xf32>
    %cst_5 = arith.constant 0.000000e+00 : f32
    %6 = vector.broadcast %cst_5 : f32 to vector<6x128xf32>
    %7 = arith.subf %6, %5 : vector<6x128xf32>
    %8 = math.exp %7 : vector<6x128xf32>
    %cst_6 = arith.constant 1.000000e+00 : f32
    %9 = vector.broadcast %cst_6 : f32 to vector<6x128xf32>
    %10 = arith.addf %9, %8 : vector<6x128xf32>
    %cst_7 = arith.constant 1.000000e+00 : f32
    %11 = vector.broadcast %cst_7 : f32 to vector<6x128xf32>
    %12 = arith.divf %11, %10 : vector<6x128xf32>
    %c0_8 = arith.constant 0 : index
    %c0_9 = arith.constant 0 : index
    %13 = vector.load %arg4[%c0_8, %c0_9] : memref<4x6xf32, #tpu.memory_space<vmem>>, vector<4x6xf32>
    %cst_10 = arith.constant dense<0.000000e+00> : vector<4x128xf32>
    %14 = tpu.matmul %13, %12, %cst_10 {dimension_numbers = #tpu.dot_dimension_numbers<[1], [0], [0], [1], [0, 0, 1, 1], [], []>} : vector<4x6xf32>, vector<6x128xf32>, vector<4x128xf32> -> vector<4x128xf32>
    %c0_11 = arith.constant 0 : index
    %c0_12 = arith.constant 0 : index
    %15 = vector.load %arg5[%c0_11, %c0_12] : memref<4x1xf32, #tpu.memory_space<vmem>>, vector<4x1xf32>
    %16 = vector.broadcast %15 : vector<4x1xf32> to vector<4x128xf32>
    %17 = arith.addf %14, %16 : vector<4x128xf32>
    %cst_13 = arith.constant 0.000000e+00 : f32
    %18 = vector.broadcast %cst_13 : f32 to vector<4x128xf32>
    %19 = arith.subf %18, %17 : vector<4x128xf32>
    %20 = math.exp %19 : vector<4x128xf32>
    %cst_14 = arith.constant 1.000000e+00 : f32
    %21 = vector.broadcast %cst_14 : f32 to vector<4x128xf32>
    %22 = arith.addf %21, %20 : vector<4x128xf32>
    %cst_15 = arith.constant 1.000000e+00 : f32
    %23 = vector.broadcast %cst_15 : f32 to vector<4x128xf32>
    %24 = arith.divf %23, %22 : vector<4x128xf32>
    %c0_16 = arith.constant 0 : index
    %c0_17 = arith.constant 0 : index
    %25 = vector.load %arg6[%c0_16, %c0_17] : memref<1x4xf32, #tpu.memory_space<vmem>>, vector<1x4xf32>
    %cst_18 = arith.constant dense<0.000000e+00> : vector<1x128xf32>
    %26 = tpu.matmul %25, %24, %cst_18 {dimension_numbers = #tpu.dot_dimension_numbers<[1], [0], [0], [1], [0, 0, 1, 1], [], []>} : vector<1x4xf32>, vector<4x128xf32>, vector<1x128xf32> -> vector<1x128xf32>
    %c0_19 = arith.constant 0 : index
    %c0_20 = arith.constant 0 : index
    %27 = vector.load %arg7[%c0_19, %c0_20] : memref<1x1xf32, #tpu.memory_space<vmem>>, vector<1x1xf32>
    %28 = vector.broadcast %27 : vector<1x1xf32> to vector<1x128xf32>
    %29 = arith.addf %26, %28 : vector<1x128xf32>
    %cst_21 = arith.constant 0.000000e+00 : f32
    %30 = vector.broadcast %cst_21 : f32 to vector<1x128xf32>
    %31 = arith.subf %30, %29 : vector<1x128xf32>
    %32 = math.exp %31 : vector<1x128xf32>
    %cst_22 = arith.constant 1.000000e+00 : f32
    %33 = vector.broadcast %cst_22 : f32 to vector<1x128xf32>
    %34 = arith.addf %33, %32 : vector<1x128xf32>
    %cst_23 = arith.constant 1.000000e+00 : f32
    %35 = vector.broadcast %cst_23 : f32 to vector<1x128xf32>
    %36 = arith.divf %35, %34 : vector<1x128xf32>
    %c0_24 = arith.constant 0 : index
    %c0_25 = arith.constant 0 : index
    %37 = vector.load %arg8[%c0_24, %c0_25] : memref<1x128xf32, #tpu.memory_space<vmem>>, vector<1x128xf32>
    tpu.vector_store %arg8[%c0_24, %c0_25], %36 {strides = array<i32>} : memref<1x128xf32, #tpu.memory_space<vmem>>, vector<1x128xf32>,
    return
  }
  func.func @transform_0(%arg0: i32) -> (i32, i32) {
    %c0_i32 = arith.constant 0 : i32
    %c0_i32_0 = arith.constant 0 : i32
    return %arg0, %c0_i32 : i32, i32
  }
  func.func @transform_1(%arg0: i32) -> (i32, i32) {
    %c0_i32 = arith.constant 0 : i32
    %c0_i32_0 = arith.constant 0 : i32
    %c0_i32_1 = arith.constant 0 : i32
    return %c0_i32, %c0_i32_0 : i32, i32
  }
  func.func @transform_2(%arg0: i32) -> (i32, i32) {
    %c0_i32 = arith.constant 0 : i32
    %c0_i32_0 = arith.constant 0 : i32
    %c0_i32_1 = arith.constant 0 : i32
    return %c0_i32, %c0_i32_0 : i32, i32
  }
  func.func @transform_3(%arg0: i32) -> (i32, i32) {
    %c0_i32 = arith.constant 0 : i32
    %c0_i32_0 = arith.constant 0 : i32
    %c0_i32_1 = arith.constant 0 : i32
    return %c0_i32, %c0_i32_0 : i32, i32
  }
  func.func @transform_4(%arg0: i32) -> (i32, i32) {
    %c0_i32 = arith.constant 0 : i32
    %c0_i32_0 = arith.constant 0 : i32
    %c0_i32_1 = arith.constant 0 : i32
    return %c0_i32, %c0_i32_0 : i32, i32
  }
  func.func @transform_5(%arg0: i32) -> (i32, i32) {
    %c0_i32 = arith.constant 0 : i32
    %c0_i32_0 = arith.constant 0 : i32
    %c0_i32_1 = arith.constant 0 : i32
    return %c0_i32, %c0_i32_0 : i32, i32
  }
  func.func @transform_6(%arg0: i32) -> (i32, i32) {
    %c0_i32 = arith.constant 0 : i32
    %c0_i32_0 = arith.constant 0 : i32
    %c0_i32_1 = arith.constant 0 : i32
    return %c0_i32, %c0_i32_0 : i32, i32
  }
  func.func @transform_7(%arg0: i32) -> (i32, i32) {
    %c0_i32 = arith.constant 0 : i32
    %c0_i32_0 = arith.constant 0 : i32
    return %c0_i32, %arg0 : i32, i32
  }
}

</mosaic_0001>

<bundles_post_ra>
// kernel: wide_and_deep.1
= control target key start
LH: loop header
LB: loop body
LE: loop exit
PB: predicated region body
PF: predicated region fallthrough
CT: control target
= control target key end

     0   :  { %vm51_vm0 = vcmask 64512   ;;  %v292_v10 = vmov 0   ;;  %vm153_vm4 = vcmask 1045504   ;;  %vm149_vm6 = vcmask 48128   ;;  %s419_s0 = inlined_call_operand.vmem [shape: f32[128,8], index: 0, kind: input, shape index: {}]   ;;  %s420_s2 = inlined_call_operand.vmem [shape: f32[6,1], index: 2, kind: input, shape index: {}]   ;;  %s421_s4 = inlined_call_operand.vmem [shape: f32[4,1], index: 4, kind: input, shape index: {}]   ;;  %s422_s1 = inlined_call_operand.vmem [shape: f32[6,8], index: 1, kind: input, shape index: {}]   ;;  %s423_s3 = inlined_call_operand.vmem [shape: f32[4,6], index: 3, kind: input, shape index: {}]   ;;  %s424_s6 = inlined_call_operand.<no memory space> [shape: f32[1,1], index: 6, kind: input, shape index: {}]   ;;  %s425_s5 = inlined_call_operand.vmem [shape: f32[1,4], index: 5, kind: input, shape index: {}]   ;;  %s426_s7 = inlined_call_operand.vmem [shape: f32[1,128], index: 7, kind: output, shape index: {}]  }
   0x1   :  { %v43_v0 = vld [vmem:[%s419_s0 + $0x78] sm:$0xff]  ;;  %v42_v1 = vld [vmem:[%s419_s0 + $0x70] sm:$0xff]  ;;  %v41_v2 = vld [vmem:[%s419_s0 + $0x68] sm:$0xff]  ;;  %278 = vset.pattern.permute.xlu0 %v292_v10  ;;  %279 = vset.pattern.permute.xlu1 %v292_v10  ;;  %v12_v41 = vstv %s424_s6  ;;  %vm208_vm10 = vcmask 1043456   ;;  %vm204_vm12 = vcmask 31744  }
   0x2   :  { %256 = vmatpush.xpose.msk.msra.mxu0 %vm51_vm0, %v43_v0  ;;  %v40_v3 = vld [vmem:[%s419_s0 + $0x60] sm:$0xff]  ;;  %v39_v4 = vld [vmem:[%s419_s0 + $0x58] sm:$0xff]  ;;  %v38_v5 = vld [vmem:[%s419_s0 + $0x50] sm:$0xff]  ;;  %13 = vst [vmem:[#allocation2] sm:$0x1] %v12_v41 }
   0x3   :  { %v37_v6 = vld [vmem:[%s419_s0 + $0x48] sm:$0xff]  ;;  %v36_v7 = vld [vmem:[%s419_s0 + $0x40] sm:$0xff]  ;;  %v35_v8 = vld [vmem:[%s419_s0 + $0x38] sm:$0xff] }
   0x4   :  { %v45_v9 = vld [vmem:[%s420_s2] sm:$0x3f]  ;;  %v34_v11 = vld [vmem:[%s419_s0 + $0x30] sm:$0xff]  ;;  %v33_v12 = vld [vmem:[%s419_s0 + $0x28] sm:$0xff] }
   0x5   :  { %48 = vperm.xlu0 %278, %v45_v9   ;;  %v143_v13 = vld [vmem:[%s421_s4] sm:$0xf]  ;;  %v31_v15 = vld [vmem:[%s419_s0 + $0x18] sm:$0xff]  ;;  %v30_v16 = vld [vmem:[%s419_s0 + $0x10] sm:$0xff] }
   0x6   :  { %257 = vmatpush.xpose.msk.msra.mxu0 %vm51_vm0, %v42_v1  ;;  %v32_v14 = vld [vmem:[%s419_s0 + $0x20] sm:$0xff]  ;;  %v29_v17 = vld [vmem:[%s419_s0 + $0x8] sm:$0xff] }
   0x7   :  { %v28_v18 = vld [vmem:[%s419_s0] sm:$0xff] }
   0x8   :  { %v44_v19 = vld [vmem:[%s422_s1] sm:$0x3f] }
   0x9   :  { %v142_v36 = vld [vmem:[%s423_s3] sm:$0xf] }
   0xa   :  { %258 = vmatpush.xpose.msk.msra.mxu0 %vm51_vm0, %v41_v2  ;;  %v197_v44 = vld [vmem:[#allocation2] sm:$0x1] }
   0xb   :  { %200 = vperm.xlu1 %279, %v197_v44   ;;  %v196_v56 = vld [vmem:[%s425_s5] sm:$0x1] }
   0xd   :  { %146 = vperm.xlu0 %278, %v143_v13  }
   0xe   :  { %259 = vmatpush.xpose.msk.msra.mxu0 %vm51_vm0, %v40_v3 }
  0x12   :  { %260 = vmatpush.xpose.msk.msra.mxu0 %vm51_vm0, %v39_v4 }
  0x16   :  { %261 = vmatpush.xpose.msk.msra.mxu0 %vm51_vm0, %v38_v5 }
  0x1a   :  { %262 = vmatpush.xpose.msk.msra.mxu0 %vm51_vm0, %v37_v6 }
  0x1e   :  { %263 = vmatpush.xpose.msk.msra.mxu0 %vm51_vm0, %v36_v7 }
  0x22   :  { %264 = vmatpush.xpose.msk.msra.mxu0 %vm51_vm0, %v35_v8 }
  0x26   :  { %265 = vmatpush.xpose.msk.msra.mxu0 %vm51_vm0, %v34_v11 }
  0x2a   :  { %266 = vmatpush.xpose.msk.msra.mxu0 %vm51_vm0, %v33_v12 }
  0x2e   :  { %267 = vmatpush.xpose.msk.msra.mxu0 %vm51_vm0, %v32_v14 }
  0x32   :  { %268 = vmatpush.xpose.msk.msra.mxu0 %vm51_vm0, %v31_v15 }
  0x36   :  { %269 = vmatpush.xpose.msk.msra.mxu0 %vm51_vm0, %v30_v16 }
  0x3a   :  { %270 = vmatpush.xpose.msk.msra.mxu0 %vm51_vm0, %v29_v17 }
  0x3e   :  { %271 = vmatpush.xpose.msk.msra.mxu0 %vm51_vm0, %v28_v18 }
  0x41   :  { %272 = vmatmul.msk.f32.vlgmr.msra.gmra.mxu0 %vm51_vm0, %v44_v19 }
  0x77   :  { %v49_v20 = vpop.permute.xlu0 %48 }
  0x7d   :  { %v201_v58 = vpop.permute.xlu1 %200 }
  0x7e   :  { %v203_v59 = vperm.slane %v201_v58, 0 }
  0x7f   :  { %v147_v38 = vpop.permute.xlu0 %146 }
  0xbe   :  { %v120_v21 = vpop.f32.mrf.mxu0 }
  0xbf   :  { %v121_v22 = vadd.f32 %v120_v21, %v49_v20 }
  0xc1   :  { %v123_v23 = vsub.f32 0.0, %v121_v22 }
  0xc3   :  { %v124_v24 = vmul.f32 1.442695, %v123_v23 }
  0xc5   :  { %280 = vpow2.f32 %v124_v24 }
  0xcb   :  { %v281_v25 = vpop.eup %280 }
  0xcc   :  { %v126_v26 = vadd.f32 1.0, %v281_v25 }
  0xce   :  { %282 = vrcp.f32 %v126_v26  ;;  %v138_v30 = vand.u32 2147483648, %v126_v26  ;;  %v136_v32 = vand.u32 2147483647, %v126_v26  ;;  %vm132_vm2 = vweird.f32 %v126_v26 }
  0xd0   :  { %v139_v34 = vor.u32 1.1754944e-38, %v138_v30  ;;  %vm137_vm5 = vcmp.eq.f32.partialorder %v136_v32, 8.507059e+37 }
  0xd4   :  { %v283_v27 = vpop.eup %282 }
  0xd5   :  { %v128_v28 = vmul.f32 %v283_v27, %v126_v26  ;;  %vm133_vm1 = vweird.f32 %v283_v27 }
  0xd6   :  { %vm134_vm3 = vmor %vm132_vm2, %vm133_vm1 }
  0xd7   :  { %v129_v29 = vsub.f32 1.0, %v128_v28 }
  0xd9   :  { %v130_v31 = vmul.f32 %v283_v27, %v129_v29 }
  0xdb   :  { %v131_v33 = vadd.f32 %v283_v27, %v130_v31 }
  0xdd   :  { %v135_v35 = vsel %vm134_vm3, %v283_v27, %v131_v33 }
  0xde   :  { %v140_v37 = vsel %vm137_vm5, %v139_v34, %v135_v35 }
  0xdf   :  { %273 = vmatpush.msk.msra.mxu1 %vm153_vm4, %v140_v37 }
  0xe0   :  { %274 = vmatmul.msk.f32.vlgmr.msra.gmra.mxu1 %vm149_vm6, %v142_v36 }
 0x15d   :  { %v174_v39 = vpop.f32.mrf.mxu1 }
 0x15e   :  { %v175_v40 = vadd.f32 %v174_v39, %v147_v38 }
 0x160   :  { %v177_v42 = vsub.f32 0.0, %v175_v40 }
 0x162   :  { %v178_v43 = vmul.f32 1.442695, %v177_v42 }
 0x164   :  { %284 = vpow2.f32 %v178_v43 }
 0x16a   :  { %v285_v45 = vpop.eup %284 }
 0x16b   :  { %v180_v46 = vadd.f32 1.0, %v285_v45 }
 0x16d   :  { %286 = vrcp.f32 %v180_v46  ;;  %v192_v50 = vand.u32 2147483648, %v180_v46  ;;  %v190_v52 = vand.u32 2147483647, %v180_v46  ;;  %vm186_vm8 = vweird.f32 %v180_v46 }
 0x16f   :  { %v193_v54 = vor.u32 1.1754944e-38, %v192_v50  ;;  %vm191_vm11 = vcmp.eq.f32.partialorder %v190_v52, 8.507059e+37 }
 0x173   :  { %v287_v47 = vpop.eup %286 }
 0x174   :  { %v182_v48 = vmul.f32 %v287_v47, %v180_v46  ;;  %vm187_vm7 = vweird.f32 %v287_v47 }
 0x175   :  { %vm188_vm9 = vmor %vm186_vm8, %vm187_vm7 }
 0x176   :  { %v183_v49 = vsub.f32 1.0, %v182_v48 }
 0x178   :  { %v184_v51 = vmul.f32 %v287_v47, %v183_v49 }
 0x17a   :  { %v185_v53 = vadd.f32 %v287_v47, %v184_v51 }
 0x17c   :  { %v189_v55 = vsel %vm188_vm9, %v287_v47, %v185_v53 }
 0x17d   :  { %v194_v57 = vsel %vm191_vm11, %v193_v54, %v189_v55 }
 0x17e   :  { %275 = vmatpush.msk.msra.mxu2 %vm208_vm10, %v194_v57 }
 0x17f   :  { %276 = vmatmul.msk.f32.vlgmr.msra.gmra.mxu2 %vm204_vm12, %v196_v56 }
 0x202   :  { %v229_v60 = vpop.f32.mrf.mxu2 }
 0x203   :  { %v230_v61 = vadd.f32 %v229_v60, %v203_v59 }
 0x205   :  { %v232_v62 = vsub.f32 0.0, %v230_v61 }
 0x207   :  { %v233_v63 = vmul.f32 1.442695, %v232_v62 }
 0x209   :  { %288 = vpow2.f32 %v233_v63 }
 0x20f   :  { %v289_v0 = vpop.eup %288 }
 0x210   :  { %v235_v1 = vadd.f32 1.0, %v289_v0 }
 0x212   :  { %290 = vrcp.f32 %v235_v1  ;;  %v247_v5 = vand.u32 2147483648, %v235_v1  ;;  %v245_v7 = vand.u32 2147483647, %v235_v1  ;;  %vm241_vm14 = vweird.f32 %v235_v1 }
 0x214   :  { %v248_v9 = vor.u32 1.1754944e-38, %v247_v5  ;;  %vm246_vm0 = vcmp.eq.f32.partialorder %v245_v7, 8.507059e+37 }
 0x218   :  { %v291_v2 = vpop.eup %290 }
 0x219   :  { %v237_v3 = vmul.f32 %v291_v2, %v235_v1  ;;  %vm242_vm13 = vweird.f32 %v291_v2 }
 0x21a   :  { %vm243_vm15 = vmor %vm241_vm14, %vm242_vm13 }
 0x21b   :  { %v238_v4 = vsub.f32 1.0, %v237_v3 }
 0x21d   :  { %v239_v6 = vmul.f32 %v291_v2, %v238_v4 }
 0x21f   :  { %v240_v8 = vadd.f32 %v291_v2, %v239_v6 }
 0x221   :  { %v244_v10 = vsel %vm243_vm15, %v291_v2, %v240_v8 }
 0x222   :  { %v249_v11 = vsel %vm246_vm0, %v248_v9, %v244_v10 }
 0x223   :  { %251 = vst [vmem:[%s426_s7] sm:$0x1] %v249_v11 }

</bundles_post_ra>
